<compile_context>
chip_gen: v5e
topology: v5e:2x2
jax: 0.10.0
libtpu: 0.0.40
codegen_flags: <defaults>
</compile_context>

<pallas_src>
import functools

import jax
import jax.numpy as jnp
from jax.experimental import pallas as pl
from jax.experimental.pallas import tpu as pltpu


def _ls_ce_kernel(pred_ref, tgt_ref, loss_ref, *, smoothing, num_classes):
    confidence = 1.0 - smoothing
    uniform_w = smoothing / num_classes

    x = pred_ref[...]                                              # (tn, C), input dtype

    # Row max is exact in the input dtype (bf16/f32); avoids a materialized
    # f32 copy of the whole block just for the max pass.
    m = jnp.max(x, axis=-1, keepdims=True).astype(jnp.float32)     # (tn, 1)

    # Softmax denominator; accumulate in f32 (per-use upcast of x).
    p = jnp.exp(x.astype(jnp.float32) - m)                         # (tn, C)
    lse = jnp.log(jnp.sum(p, axis=-1, keepdims=True))              # (tn, 1)

    # Fused target-gather + uniform-smoothing term in a single weighted pass:
    #   loss = (m + lse) - [ confidence * x[tgt] + (smoothing/C) * sum_c x ]
    tgt = tgt_ref[...]                                             # (tn, 1) int32
    col = jax.lax.broadcasted_iota(jnp.int32, x.shape, 1)
    w = jnp.where(col == tgt,
                  jnp.float32(confidence + uniform_w),
                  jnp.float32(uniform_w))                          # (tn, C)
    wx = jnp.sum(w * x.astype(jnp.float32), axis=-1, keepdims=True)  # (tn, 1)

    loss_ref[...] = (m + lse) - wx


def _device_budgets():
    """Return (target_block_bytes, vmem_limit_bytes), generation-aware."""
    vmem_bytes = None
    try:
        info = pltpu.get_tpu_info()
        vmem_bytes = int(getattr(info, "vmem_capacity_bytes", 0)) or None
    except Exception:
        vmem_bytes = None
    if vmem_bytes is None or vmem_bytes <= (64 << 20):
        # v7x (64 MiB VMEM per TensorCore) or unknown: conservative budgets.
        return 6 << 20, 44 << 20
    # v5e / v6e (128 MiB VMEM): bigger blocks, higher scoped-VMEM limit.
    return 12 << 20, 96 << 20


def _pick_tile_n(N, C, itemsize, target_block_bytes):
    """Tile rows so one block is ~target_block_bytes (budgeted in f32 terms)."""
    def rup(v, m):
        return ((v + m - 1) // m) * m

    # Packed sublane multiple for the input dtype: f32->8, bf16->16, int8/fp8->32.
    sublane_mult = max(8, 32 // max(1, itemsize))
    # Budget rows by their f32 footprint so in-kernel f32 temporaries stay
    # bounded even for narrow input dtypes.
    row_bytes = max(1, C) * 4
    rows_cap = max(sublane_mult,
                   (target_block_bytes // row_bytes) // sublane_mult * sublane_mult)

    n_up = rup(N, sublane_mult)
    if n_up > rows_cap:
        return rows_cap                     # many steps; padding <= one tile

    # Whole batch fits in one target-sized block: still split into 2-4 grid
    # steps (when there is enough work) so the "parallel" grid axis can shard
    # rows across both v7x TensorCores and the pipeline overlaps DMA/compute.
    min_split_rows = max(sublane_mult, 256)
    if n_up >= 4 * min_split_rows:
        return rup(pl.cdiv(n_up, 4), sublane_mult)
    if n_up >= 2 * min_split_rows:
        return rup(pl.cdiv(n_up, 2), sublane_mult)
    return n_up


def label_smoothing_cross_entropy(pred, target, *, smoothing=0.1, tile_n=None):
    """pred: [N, C] float (f32 or bf16), target: [N] int -> scalar mean loss (f32)."""
    N, C = pred.shape
    itemsize = jnp.dtype(pred.dtype).itemsize
    target_block_bytes, vmem_limit = _device_budgets()
    if tile_n is None:
        tile_n = _pick_tile_n(N, C, itemsize, target_block_bytes)

    n_pad = pl.cdiv(N, tile_n) * tile_n
    target2d = target.astype(jnp.int32).reshape(N, 1)
    if n_pad != N:
        # TODO(synk): ignore_index-style targets (e.g. -100) are not handled;
        # the original module has no ignore_index either.
        pred = jnp.pad(pred, ((0, n_pad - N), (0, 0)))
        target2d = jnp.pad(target2d, ((0, n_pad - N), (0, 0)))  # pad target = class 0

    kernel = functools.partial(_ls_ce_kernel,
                               smoothing=float(smoothing), num_classes=C)

    per_row = pl.pallas_call(
        kernel,
        out_shape=jax.ShapeDtypeStruct((n_pad, 1), jnp.float32),
        grid_spec=pltpu.PrefetchScalarGridSpec(
            num_scalar_prefetch=0,
            grid=(n_pad // tile_n,),
            in_specs=[
                pl.BlockSpec((tile_n, C), lambda i: (i, 0)),
                pl.BlockSpec((tile_n, 1), lambda i: (i, 0)),
            ],
            out_specs=pl.BlockSpec((tile_n, 1), lambda i: (i, 0)),
        ),
        compiler_params=pltpu.CompilerParams(
            dimension_semantics=("parallel",),       # carry-free -> shard across TCs
            vmem_limit_bytes=int(vmem_limit),        # generation-aware scoped VMEM
        ),
    )(pred, target2d)

    # Drop padded rows, tiny final reduction in plain JAX (f32 accumulation).
    return jnp.sum(per_row[:N, 0]) / jnp.float32(N)


def _reference(pred, target, smoothing=0.1):
    confidence = 1.0 - smoothing
    logprobs = jax.nn.log_softmax(pred.astype(jnp.float32), axis=-1)
    nll = -jnp.take_along_axis(logprobs, target[:, None], axis=-1)[:, 0]
    smooth = -jnp.mean(logprobs, axis=-1)
    return jnp.mean(confidence * nll + smoothing * smooth)


if __name__ == "__main__":
    key = jax.random.PRNGKey(0)
    k1, k2 = jax.random.split(key)
    N, C = 8, 32
    pred = jax.random.normal(k1, (N, C), dtype=jnp.float32)
    target = jax.random.randint(k2, (N,), 0, C, dtype=jnp.int32)

    loss = label_smoothing_cross_entropy(pred, target, smoothing=0.1)
    loss = jax.block_until_ready(loss)

    ref = _reference(pred, target, smoothing=0.1)
    assert jnp.allclose(loss, ref, atol=1e-5, rtol=1e-5), (loss, ref)
    print("KERNEL_OK")
</pallas_src>

<mosaic_0001>
module attributes {stable_mosaic.version = 11 : i64} {
  func.func @_ls_ce_kernel(%arg0: i32, %arg1: memref<8x32xf32, #tpu.memory_space<vmem>>, %arg2: memref<8x1xi32, #tpu.memory_space<vmem>>, %arg3: memref<8x1xf32, #tpu.memory_space<vmem>>) attributes {dimension_semantics = [#tpu.dimension_semantics<parallel>], iteration_bounds = array<i64: 1>, scalar_prefetch = 0 : i64, scratch_operands = 0 : i64, tpu.core_type = #tpu.core_type<tc>, window_params = [{transform_indices = @transform_0, window_bounds = array<i64: 8, 32>}, {transform_indices = @transform_1, window_bounds = array<i64: 8, 1>}, {transform_indices = @transform_2, window_bounds = array<i64: 8, 1>}]} {
    %c0 = arith.constant 0 : index
    %c0_0 = arith.constant 0 : index
    %0 = vector.load %arg1[%c0, %c0_0] : memref<8x32xf32, #tpu.memory_space<vmem>>, vector<8x32xf32>
    %cst = arith.constant dense<0xFF800000> : vector<8xf32>
    %1 = vector.multi_reduction <maximumf>, %0, %cst [1] : vector<8x32xf32> to vector<8xf32>
    %2 = vector.shape_cast %1 : vector<8xf32> to vector<8x1xf32>
    %3 = vector.broadcast %2 : vector<8x1xf32> to vector<8x32xf32>
    %4 = arith.subf %0, %3 : vector<8x32xf32>
    %5 = math.exp %4 : vector<8x32xf32>
    %cst_1 = arith.constant dense<0.000000e+00> : vector<8xf32>
    %6 = vector.multi_reduction <add>, %5, %cst_1 [1] : vector<8x32xf32> to vector<8xf32>
    %7 = vector.shape_cast %6 : vector<8xf32> to vector<8x1xf32>
    %8 = math.log %7 : vector<8x1xf32>
    %c0_2 = arith.constant 0 : index
    %c0_3 = arith.constant 0 : index
    %9 = vector.load %arg2[%c0_2, %c0_3] : memref<8x1xi32, #tpu.memory_space<vmem>>, vector<8x1xi32>
    %10 = tpu.iota {dimensions = array<i32: 1>} : vector<8x32xi32>
    %11 = vector.broadcast %9 : vector<8x1xi32> to vector<8x32xi32>
    %12 = arith.cmpi eq, %10, %11 : vector<8x32xi32>
    %cst_4 = arith.constant 0.903124988 : f32
    %cst_5 = arith.constant 3.125000e-03 : f32
    %13 = vector.broadcast %cst_4 : f32 to vector<8x32xf32>
    %14 = vector.broadcast %cst_5 : f32 to vector<8x32xf32>
    %15 = arith.select %12, %13, %14 : vector<8x32xi1>, vector<8x32xf32>
    %16 = arith.mulf %15, %0 : vector<8x32xf32>
    %cst_6 = arith.constant dense<0.000000e+00> : vector<8xf32>
    %17 = vector.multi_reduction <add>, %16, %cst_6 [1] : vector<8x32xf32> to vector<8xf32>
    %18 = vector.shape_cast %17 : vector<8xf32> to vector<8x1xf32>
    %19 = arith.addf %2, %8 : vector<8x1xf32>
    %20 = arith.subf %19, %18 : vector<8x1xf32>
    %c0_7 = arith.constant 0 : index
    %c0_8 = arith.constant 0 : index
    %21 = vector.load %arg3[%c0_7, %c0_8] : memref<8x1xf32, #tpu.memory_space<vmem>>, vector<8x1xf32>
    tpu.vector_store %arg3[%c0_7, %c0_8], %20 {strides = array<i32>} : memref<8x1xf32, #tpu.memory_space<vmem>>, vector<8x1xf32>,
    return
  }
  func.func @transform_0(%arg0: i32) -> (i32, i32) {
    %c0_i32 = arith.constant 0 : i32
    %c0_i32_0 = arith.constant 0 : i32
    return %arg0, %c0_i32 : i32, i32
  }
  func.func @transform_1(%arg0: i32) -> (i32, i32) {
    %c0_i32 = arith.constant 0 : i32
    %c0_i32_0 = arith.constant 0 : i32
    return %arg0, %c0_i32 : i32, i32
  }
  func.func @transform_2(%arg0: i32) -> (i32, i32) {
    %c0_i32 = arith.constant 0 : i32
    %c0_i32_0 = arith.constant 0 : i32
    return %arg0, %c0_i32 : i32, i32
  }
}

</mosaic_0001>

<bundles_post_ra>
// kernel: tpu_custom_call.1
= control target key start
LH: loop header
LB: loop body
LE: loop exit
PB: predicated region body
PF: predicated region fallthrough
CT: control target
= control target key end

     0   :  { %vm12_vm0 = vcmask 261120   ;;  %v51_v1 = vmov 0   ;;  %v25_v9 = vlaneseq  ;;  %v52_v12 = vmov 0.003125   ;;  %s80_s0 = inlined_call_operand.vmem [shape: f32[8,32], index: 0, kind: input, shape index: {}]   ;;  %s81_s1 = inlined_call_operand.vmem [shape: s32[8,1], index: 1, kind: input, shape index: {}]   ;;  %s82_s2 = inlined_call_operand.vmem [shape: f32[8,1], index: 2, kind: output, shape index: {}]  }
   0x1   :  { %v11_v0 = vld [vmem:[%s80_s0] sm:$0xff]  ;;  %46 = vset.pattern.permute.xlu0 %v51_v1  ;;  %vm38_vm2 = vcmask 7168  }
   0x2   :  { %v13_v2 = vsel %vm12_vm0, %v11_v0, -inf  ;;  %v24_v3 = vld [vmem:[%s81_s1] sm:$0xff]  ;;  %v26_v10 = vand.u32 127, %v25_v9 }
   0x3   :  { %14 = vmax.xlane.f32.xlu0 %v13_v2 }
  0x17   :  { %28 = vperm.xlu0 %46, %v24_v3  }
  0x76   :  { %v15_v4 = vpop.xlane.xlu0 %14 }
  0x77   :  { %v16_v5 = vsub.f32 %v11_v0, %v15_v4 }
  0x79   :  { %v17_v6 = vmul.f32 1.442695, %v16_v5 }
  0x7b   :  { %47 = vpow2.f32 %v17_v6 }
  0x81   :  { %v48_v7 = vpop.eup %47 }
  0x82   :  { %v19_v8 = vsel %vm12_vm0, %v48_v7, 0.0 }
  0x83   :  { %20 = vadd.xlane.f32.xlu1 %v19_v8 }
  0x89   :  { %v29_v11 = vpop.permute.xlu0 %28 }
  0x8a   :  { %vm30_vm1 = vcmp.eq.s32.totalorder %v26_v10, %v29_v11 }
  0x8b   :  { %v31_v13 = vsel %vm30_vm1, 0.903125, %v52_v12 }
  0x8c   :  { %v32_v14 = vmul.f32 %v31_v13, %v11_v0 }
  0x8e   :  { %v33_v15 = vsel %vm12_vm0, %v32_v14, 0.0 }
  0x8f   :  { %34 = vadd.xlane.f32.xlu1 %v33_v15 }
  0xf6   :  { %v21_v16 = vpop.xlane.xlu1 %20 }
  0xf7   :  { %49 = vlog2.f32 %v21_v16 }
  0xfd   :  { %v50_v17 = vpop.eup %49 }
  0xfe   :  { %v23_v18 = vmul.f32 0.6931472, %v50_v17 }
 0x100   :  { %v36_v19 = vadd.f32 %v23_v18, %v15_v4 }
 0x102   :  { %v35_v20 = vpop.xlane.xlu1 %34 }
 0x103   :  { %v37_v21 = vsub.f32 %v36_v19, %v35_v20 }
 0x105   :  { %39 = vst.msk [vmem:[%s82_s2] sm:$0xff] %vm38_vm2, %v37_v21 }

</bundles_post_ra>
